<compile_context>
chip_gen: v5e
topology: v5e:2x2
jax: 0.10.0
libtpu: 0.0.40
codegen_flags: <defaults>
</compile_context>

<pallas_src>
import jax
import jax.numpy as jnp
from jax.experimental import pallas as pl
from jax.experimental.pallas import tpu as pltpu

LANE = 128              # TPU lane width
DEFAULT_TILE_B = 512    # f32 x-tile (512, 784) ~1.8 MiB; well under 16 MiB scoped VMEM (v5e)


def _linear_kernel(x_ref, w_ref, b_ref, o_ref):
    # x_ref: (TILE_B, D) f32   w_ref: (D, O_pad) f32   b_ref: (1, O_pad) f32
    # o_ref: (TILE_B, O_pad) f32
    o_ref[...] = (
        jnp.dot(x_ref[...], w_ref[...], preferred_element_type=jnp.float32)
        + b_ref[...]
    ).astype(o_ref.dtype)


def prepare_params(weight, bias):
    """One-time parameter prep (call once, outside the per-step forward).

    weight : (O, D) float32  (PyTorch nn.Linear layout)
    bias   : (O,)   float32
    returns: w_t_pad (D, O_pad) and b_pad (1, O_pad) with O padded to a
             multiple of 128 lanes (zero padding -> padded logits are exactly 0
             and are sliced off after the kernel).
    """
    O, D = weight.shape
    o_pad = max(LANE, ((O + LANE - 1) // LANE) * LANE)
    w_t_pad = jnp.zeros((D, o_pad), dtype=jnp.float32).at[:, :O].set(weight.T)
    b_pad = jnp.zeros((1, o_pad), dtype=jnp.float32).at[0, :O].set(bias)
    return w_t_pad, b_pad


def mclr_forward(x, w_t_pad, b_pad, output_dim, tile_b=DEFAULT_TILE_B):
    """Forward pass of Mclr_CrossEntropy.

    x        : (B, ...) float32, flattened from axis 1 (e.g. (B, 1, 28, 28))
    w_t_pad  : (D, O_pad) float32 from prepare_params
    b_pad    : (1, O_pad) float32 from prepare_params
    returns  : (B, output_dim) float32 logits
    """
    B = x.shape[0]
    x_flat = x.reshape(B, -1)                     # torch.flatten(x, 1)
    D, o_pad = w_t_pad.shape
    assert x_flat.shape[1] == D

    # Full-array block when the batch is small (always legal); otherwise an
    # 8-aligned tile so x/out tiles pipeline while the weight stays resident.
    tile_b = B if B <= tile_b else tile_b
    grid = (pl.cdiv(B, tile_b),)

    cost = pl.CostEstimate(
        flops=2 * B * D * o_pad,
        transcendentals=0,
        bytes_accessed=4 * (B * D + D * o_pad + B * o_pad),
    )

    out = pl.pallas_call(
        _linear_kernel,
        out_shape=jax.ShapeDtypeStruct((B, o_pad), jnp.float32),
        grid_spec=pltpu.PrefetchScalarGridSpec(
            num_scalar_prefetch=0,
            grid=grid,
            in_specs=[
                pl.BlockSpec((tile_b, D), lambda i: (i, 0)),   # x tile: marches over batch
                pl.BlockSpec((D, o_pad), lambda i: (0, 0)),    # weight: VMEM-resident
                pl.BlockSpec((1, o_pad), lambda i: (0, 0)),    # bias:   VMEM-resident
            ],
            out_specs=pl.BlockSpec((tile_b, o_pad), lambda i: (i, 0)),
        ),
        compiler_params=pltpu.CompilerParams(
            dimension_semantics=("parallel",),                 # shard batch tiles across TCs (v7x)
        ),
        cost_estimate=cost,
    )(x_flat, w_t_pad, b_pad)

    return out[:, :output_dim]                    # drop zero-padded logit columns


if __name__ == "__main__":
    # MNIST-style shapes implied by the module defaults: input_dim=784, output_dim=10.
    input_dim = 784          # 1 * 28 * 28
    output_dim = 10
    B, C, H, W = 2, 1, 28, 28

    key = jax.random.PRNGKey(0)
    kx, kw, kb = jax.random.split(key, 3)

    # Deterministic init mimicking nn.Linear's uniform(-1/sqrt(D), 1/sqrt(D)).
    bound = 1.0 / jnp.sqrt(jnp.float32(input_dim))
    weight = jax.random.uniform(kw, (output_dim, input_dim),
                                minval=-bound, maxval=bound, dtype=jnp.float32)
    bias = jax.random.uniform(kb, (output_dim,),
                              minval=-bound, maxval=bound, dtype=jnp.float32)
    x = jax.random.normal(kx, (B, C, H, W), dtype=jnp.float32)

    # One-time parameter prep (transpose + lane padding), then the hot forward.
    w_t_pad, b_pad = prepare_params(weight, bias)
    logits = mclr_forward(x, w_t_pad, b_pad, output_dim)
    jax.block_until_ready(logits)

    # Reference check in plain JAX.
    ref = x.reshape(B, -1) @ weight.T + bias
    assert logits.shape == (B, output_dim)
    assert jnp.allclose(logits, ref, atol=1e-5, rtol=1e-5)

    print("KERNEL_OK")
</pallas_src>

<mosaic_0001>
module attributes {stable_mosaic.version = 11 : i64} {
  func.func @_linear_kernel(%arg0: i32, %arg1: memref<2x784xf32, #tpu.memory_space<vmem>>, %arg2: memref<784x128xf32, #tpu.memory_space<vmem>>, %arg3: memref<1x128xf32, #tpu.memory_space<vmem>>, %arg4: memref<2x128xf32, #tpu.memory_space<vmem>>) attributes {dimension_semantics = [#tpu.dimension_semantics<parallel>], iteration_bounds = array<i64: 1>, scalar_prefetch = 0 : i64, scratch_operands = 0 : i64, tpu.core_type = #tpu.core_type<tc>, window_params = [{transform_indices = @transform_0, window_bounds = array<i64: 2, 784>}, {pipeline_mode = #tpu.pipeline_mode<synchronous>, transform_indices = @transform_1, window_bounds = array<i64: 784, 128>}, {pipeline_mode = #tpu.pipeline_mode<synchronous>, transform_indices = @transform_2, window_bounds = array<i64: 1, 128>}, {transform_indices = @transform_3, window_bounds = array<i64: 2, 128>}]} {
    %c0 = arith.constant 0 : index
    %c0_0 = arith.constant 0 : index
    %0 = vector.load %arg1[%c0, %c0_0] : memref<2x784xf32, #tpu.memory_space<vmem>>, vector<2x784xf32>
    %c0_1 = arith.constant 0 : index
    %c0_2 = arith.constant 0 : index
    %1 = vector.load %arg2[%c0_1, %c0_2] : memref<784x128xf32, #tpu.memory_space<vmem>>, vector<784x128xf32>
    %cst = arith.constant dense<0.000000e+00> : vector<2x128xf32>
    %2 = tpu.matmul %0, %1, %cst {dimension_numbers = #tpu.dot_dimension_numbers<[1], [0], [0], [1], [0, 0, 1, 1], [], []>} : vector<2x784xf32>, vector<784x128xf32>, vector<2x128xf32> -> vector<2x128xf32>
    %c0_3 = arith.constant 0 : index
    %c0_4 = arith.constant 0 : index
    %3 = vector.load %arg3[%c0_3, %c0_4] : memref<1x128xf32, #tpu.memory_space<vmem>>, vector<1x128xf32>
    %4 = vector.broadcast %3 : vector<1x128xf32> to vector<2x128xf32>
    %5 = arith.addf %2, %4 : vector<2x128xf32>
    %c0_5 = arith.constant 0 : index
    %c0_6 = arith.constant 0 : index
    %6 = vector.load %arg4[%c0_5, %c0_6] : memref<2x128xf32, #tpu.memory_space<vmem>>, vector<2x128xf32>
    tpu.vector_store %arg4[%c0_5, %c0_6], %5 {strides = array<i32>} : memref<2x128xf32, #tpu.memory_space<vmem>>, vector<2x128xf32>,
    return
  }
  func.func @transform_0(%arg0: i32) -> (i32, i32) {
    %c0_i32 = arith.constant 0 : i32
    %c0_i32_0 = arith.constant 0 : i32
    return %arg0, %c0_i32 : i32, i32
  }
  func.func @transform_1(%arg0: i32) -> (i32, i32) {
    %c0_i32 = arith.constant 0 : i32
    %c0_i32_0 = arith.constant 0 : i32
    %c0_i32_1 = arith.constant 0 : i32
    return %c0_i32, %c0_i32_0 : i32, i32
  }
  func.func @transform_2(%arg0: i32) -> (i32, i32) {
    %c0_i32 = arith.constant 0 : i32
    %c0_i32_0 = arith.constant 0 : i32
    %c0_i32_1 = arith.constant 0 : i32
    return %c0_i32, %c0_i32_0 : i32, i32
  }
  func.func @transform_3(%arg0: i32) -> (i32, i32) {
    %c0_i32 = arith.constant 0 : i32
    %c0_i32_0 = arith.constant 0 : i32
    return %arg0, %c0_i32 : i32, i32
  }
}

</mosaic_0001>

<bundles_post_ra>
// kernel: tpu_custom_call.1
= control target key start
LH: loop header
LB: loop body
LE: loop exit
PB: predicated region body
PF: predicated region fallthrough
CT: control target
= control target key end

     0   :  { %8 = vsyncpa [#allocation3], 0  ;;  %s451_s0 = inlined_call_operand.hbm [shape: f32[2,784], index: 0, kind: input, shape index: {}]   ;;  %s452_s1 = inlined_call_operand.hbm [shape: f32[784,128], index: 1, kind: input, shape index: {}]   ;;  %s453_s2 = inlined_call_operand.vmem [shape: f32[1,128], index: 2, kind: input, shape index: {}]   ;;  %s454_s3 = inlined_call_operand.hbm [shape: f32[2,128], index: 3, kind: output, shape index: {}]  }
   0x1   :  { %9 = vsyncpa [#allocation6], 0 }
   0x2   :  { %10 = vsyncpa [#allocation4], 0  ;;  %s16_s14 = sshll.u32 %s451_s0, 4  ;;  %s414_s15 = smov [#allocation2]   ;;  %s17_s14 = int_to_ptr.hbm [resolvable:$true] %s16_s14 }
   0x3   :  { %s18_s16 = sshll.u32 %s414_s15, 4  ;;  %s26_s19 = sshll.u32 %s452_s1, 4  ;;  %s19_s16 = int_to_ptr.vmem [resolvable:$true] %s18_s16  ;;  %s27_s19 = int_to_ptr.hbm [resolvable:$true] %s26_s19 }
   0x4   :  { %21 = dma.hbm_to_vmem [thread:$0]  %s17_s14, 224, %s19_s16, [#allocation3]  }
   0x5   :  { %s415_s20 = smov [#allocation5]   ;;  %s416_s22 = smov 128  }
   0x6   :  { %s28_s21 = sshll.u32 %s415_s20, 4  ;;  %s417_s23 = smov 8   ;;  %s29_s21 = int_to_ptr.vmem [resolvable:$true] %s28_s21 }
   0x7   :  { %34 = dma.hbm_to_vmem [thread:$0]  %s27_s19, 12544, %s29_s21, [#allocation6], %s416_s22, %s416_s22, %s417_s23  }
   0x8   :  { %408 = dma.done.wait [#allocation3], 224  }
   0x9   :  { %409 = vsyncadd [#allocation3], 4294967072 }
   0xa   :  { %410 = dma.done.wait [#allocation6], 12544  }
   0xb   :  { %411 = vsyncadd [#allocation6], 4294954752  ;;  %v62_v0 = vld [vmem:[#allocation5 + $0x78] sm:$0xff]  ;;  %v61_v1 = vld [vmem:[#allocation5 + $0x70] sm:$0xff]  ;;  %vm167_vm0 = vcmask 130048   ;;  %s418_s24 = smov [#allocation7]  }
   0xc   :  { %v78_v2 = vld [vmem:[#allocation5 + $0xf8] sm:$0xff]  ;;  %170 = vmatpush.msra.mxu0 %v62_v0  ;;  %v77_v3 = vld [vmem:[#allocation5 + $0xf0] sm:$0xff]  ;;  %v60_v4 = vld [vmem:[#allocation5 + $0x68] sm:$0xff]  ;;  %s316_s25 = sshll.u32 %s418_s24, 4  ;;  %s318_s28 = sshll.u32 %s454_s3, 4  ;;  %s317_s25 = int_to_ptr.vmem [resolvable:$true] %s316_s25  ;;  %s319_s28 = int_to_ptr.hbm [resolvable:$true] %s318_s28 }
   0xd   :  { %190 = vmatpush.msra.mxu1 %v78_v2  ;;  %v76_v5 = vld [vmem:[#allocation5 + $0xe8] sm:$0xff]  ;;  %v59_v6 = vld [vmem:[#allocation5 + $0x60] sm:$0xff]  ;;  %v58_v8 = vld [vmem:[#allocation5 + $0x58] sm:$0xff] }
   0xe   :  { %171 = vmatpush.msra.mxu0 %v61_v1  ;;  %v75_v7 = vld [vmem:[#allocation5 + $0xe0] sm:$0xff]  ;;  %v74_v9 = vld [vmem:[#allocation5 + $0xd8] sm:$0xff]  ;;  %v57_v10 = vld [vmem:[#allocation5 + $0x50] sm:$0xff] }
   0xf   :  { %191 = vmatpush.msra.mxu1 %v77_v3  ;;  %v94_v11 = vld [vmem:[#allocation5 + $0x178] sm:$0xff]  ;;  %v73_v12 = vld [vmem:[#allocation5 + $0xd0] sm:$0xff]  ;;  %v92_v15 = vld [vmem:[#allocation5 + $0x168] sm:$0xff] }
  0x10   :  { %172 = vmatpush.msra.mxu0 %v60_v4  ;;  %210 = vmatpush.msra.mxu2 %v94_v11  ;;  %v93_v13 = vld [vmem:[#allocation5 + $0x170] sm:$0xff]  ;;  %v110_v14 = vld [vmem:[#allocation5 + $0x1f8] sm:$0xff]  ;;  %v56_v17 = vld [vmem:[#allocation5 + $0x48] sm:$0xff] }
  0x11   :  { %192 = vmatpush.msra.mxu1 %v76_v5  ;;  %v109_v16 = vld [vmem:[#allocation5 + $0x1f0] sm:$0xff]  ;;  %v72_v18 = vld [vmem:[#allocation5 + $0xc8] sm:$0xff]  ;;  %230 = vmatpush.msra.mxu3 %v110_v14  ;;  %v91_v19 = vld [vmem:[#allocation5 + $0x160] sm:$0xff] }
  0x12   :  { %173 = vmatpush.msra.mxu0 %v59_v6  ;;  %211 = vmatpush.msra.mxu2 %v93_v13  ;;  %v108_v20 = vld [vmem:[#allocation5 + $0x1e8] sm:$0xff]  ;;  %v55_v21 = vld [vmem:[#allocation5 + $0x40] sm:$0xff]  ;;  %v90_v23 = vld [vmem:[#allocation5 + $0x158] sm:$0xff] }
  0x13   :  { %193 = vmatpush.msra.mxu1 %v75_v7  ;;  %v71_v22 = vld [vmem:[#allocation5 + $0xc0] sm:$0xff]  ;;  %231 = vmatpush.msra.mxu3 %v109_v16  ;;  %v54_v25 = vld [vmem:[#allocation5 + $0x38] sm:$0xff]  ;;  %v89_v27 = vld [vmem:[#allocation5 + $0x150] sm:$0xff] }
  0x14   :  { %174 = vmatpush.msra.mxu0 %v58_v8  ;;  %212 = vmatpush.msra.mxu2 %v92_v15  ;;  %v107_v24 = vld [vmem:[#allocation5 + $0x1e0] sm:$0xff]  ;;  %v70_v26 = vld [vmem:[#allocation5 + $0xb8] sm:$0xff]  ;;  %v53_v29 = vld [vmem:[#allocation5 + $0x30] sm:$0xff] }
  0x15   :  { %194 = vmatpush.msra.mxu1 %v74_v9  ;;  %232 = vmatpush.msra.mxu3 %v108_v20  ;;  %v106_v28 = vld [vmem:[#allocation5 + $0x1d8] sm:$0xff]  ;;  %v69_v30 = vld [vmem:[#allocation5 + $0xb0] sm:$0xff]  ;;  %v88_v31 = vld [vmem:[#allocation5 + $0x148] sm:$0xff] }
  0x16   :  { %175 = vmatpush.msra.mxu0 %v57_v10  ;;  %213 = vmatpush.msra.mxu2 %v91_v19  ;;  %v105_v32 = vld [vmem:[#allocation5 + $0x1d0] sm:$0xff]  ;;  %v52_v33 = vld [vmem:[#allocation5 + $0x28] sm:$0xff]  ;;  %v87_v35 = vld [vmem:[#allocation5 + $0x140] sm:$0xff] }
  0x17   :  { %195 = vmatpush.msra.mxu1 %v73_v12  ;;  %233 = vmatpush.msra.mxu3 %v107_v24  ;;  %v68_v34 = vld [vmem:[#allocation5 + $0xa8] sm:$0xff]  ;;  %v51_v37 = vld [vmem:[#allocation5 + $0x20] sm:$0xff]  ;;  %v86_v39 = vld [vmem:[#allocation5 + $0x138] sm:$0xff] }
  0x18   :  { %176 = vmatpush.msra.mxu0 %v56_v17  ;;  %214 = vmatpush.msra.mxu2 %v90_v23  ;;  %v104_v36 = vld [vmem:[#allocation5 + $0x1c8] sm:$0xff]  ;;  %v67_v38 = vld [vmem:[#allocation5 + $0xa0] sm:$0xff]  ;;  %v50_v41 = vld [vmem:[#allocation5 + $0x18] sm:$0xff] }
  0x19   :  { %196 = vmatpush.msra.mxu1 %v72_v18  ;;  %234 = vmatpush.msra.mxu3 %v106_v28  ;;  %v103_v40 = vld [vmem:[#allocation5 + $0x1c0] sm:$0xff]  ;;  %v66_v42 = vld [vmem:[#allocation5 + $0x98] sm:$0xff]  ;;  %v85_v43 = vld [vmem:[#allocation5 + $0x130] sm:$0xff] }
  0x1a   :  { %177 = vmatpush.msra.mxu0 %v55_v21  ;;  %215 = vmatpush.msra.mxu2 %v89_v27  ;;  %v102_v44 = vld [vmem:[#allocation5 + $0x1b8] sm:$0xff]  ;;  %v49_v45 = vld [vmem:[#allocation5 + $0x10] sm:$0xff]  ;;  %v84_v47 = vld [vmem:[#allocation5 + $0x128] sm:$0xff] }
  0x1b   :  { %197 = vmatpush.msra.mxu1 %v71_v22  ;;  %235 = vmatpush.msra.mxu3 %v105_v32  ;;  %v65_v46 = vld [vmem:[#allocation5 + $0x90] sm:$0xff]  ;;  %v48_v49 = vld [vmem:[#allocation5 + $0x8] sm:$0xff]  ;;  %v83_v51 = vld [vmem:[#allocation5 + $0x120] sm:$0xff] }
  0x1c   :  { %178 = vmatpush.msra.mxu0 %v54_v25  ;;  %216 = vmatpush.msra.mxu2 %v88_v31  ;;  %v101_v48 = vld [vmem:[#allocation5 + $0x1b0] sm:$0xff]  ;;  %v64_v50 = vld [vmem:[#allocation5 + $0x88] sm:$0xff]  ;;  %v47_v53 = vld [vmem:[#allocation5] sm:$0xff] }
  0x1d   :  { %198 = vmatpush.msra.mxu1 %v70_v26  ;;  %236 = vmatpush.msra.mxu3 %v104_v36  ;;  %v100_v52 = vld [vmem:[#allocation5 + $0x1a8] sm:$0xff]  ;;  %v63_v54 = vld [vmem:[#allocation5 + $0x80] sm:$0xff]  ;;  %v45_v55 = vld [vmem:[#allocation2] sm:$0xff] }
  0x1e   :  { %179 = vmatpush.msra.mxu0 %v53_v29  ;;  %217 = vmatpush.msra.mxu2 %v87_v35  ;;  %v126_v56 = vld [vmem:[#allocation5 + $0x278] sm:$0xff]  ;;  %151 = vst [vmem:[#allocation1] ss:$4 sm:$0xff] %v45_v55  ;;  %v99_v59 = vld [vmem:[#allocation5 + $0x1a0] sm:$0xff]  ;;  %v125_v60 = vld [vmem:[#allocation5 + $0x270] sm:$0xff] }
  0x1f   :  { %199 = vmatpush.msra.mxu1 %v69_v30  ;;  %237 = vmatpush.msra.mxu3 %v103_v40  ;;  %v142_v57 = vld [vmem:[#allocation5 + $0x2f8] sm:$0xff]  ;;  %v141_v61 = vld [vmem:[#allocation5 + $0x2f0] sm:$0xff]  ;;  %v124_v1 = vld [vmem:[#allocation5 + $0x268] sm:$0xff] }
  0x20   :  { %180 = vmatpush.msra.mxu0 %v52_v33  ;;  %218 = vmatpush.msra.mxu2 %v86_v39  ;;  %v82_v58 = vld [vmem:[#allocation5 + $0x118] sm:$0xff]  ;;  %v81_v62 = vld [vmem:[#allocation5 + $0x110] sm:$0xff]  ;;  %v140_v2 = vld [vmem:[#allocation5 + $0x2e8] sm:$0xff] }
  0x21   :  { %200 = vmatpush.msra.mxu1 %v68_v34  ;;  %238 = vmatpush.msra.mxu3 %v102_v44  ;;  %v98_v63 = vld [vmem:[#allocation5 + $0x198] sm:$0xff]  ;;  %v80_v3 = vld [vmem:[#allocation5 + $0x108] sm:$0xff]  ;;  %v97_v4 = vld [vmem:[#allocation5 + $0x190] sm:$0xff] }
  0x22   :  { %181 = vmatpush.msra.mxu0 %v51_v37  ;;  %219 = vmatpush.msra.mxu2 %v85_v43  ;;  %v46_v0 = vld [vmem:[#allocation2 + $0x8] sm:$0x3f]  ;;  %v123_v5 = vld [vmem:[#allocation5 + $0x260] sm:$0xff]  ;;  %v96_v8 = vld [vmem:[#allocation5 + $0x188] sm:$0xff] }
  0x23   :  { %201 = vmatpush.msra.mxu1 %v67_v38  ;;  %239 = vmatpush.msra.mxu3 %v101_v48  ;;  %153 = vst [vmem:[#allocation1 + $0x20] ss:$4 sm:$0xff] %v46_v0  ;;  %v139_v6 = vld [vmem:[#allocation5 + $0x2e0] sm:$0xff]  ;;  %v122_v9 = vld [vmem:[#allocation5 + $0x258] sm:$0xff]  ;;  %v121_v13 = vld [vmem:[#allocation5 + $0x250] sm:$0xff] }
  0x24   :  { %182 = vmatpush.msra.mxu0 %v50_v41  ;;  %220 = vmatpush.msra.mxu2 %v84_v47  ;;  %v79_v7 = vld [vmem:[#allocation5 + $0x100] sm:$0xff]  ;;  %v138_v10 = vld [vmem:[#allocation5 + $0x2d8] sm:$0xff]  ;;  %v137_v14 = vld [vmem:[#allocation5 + $0x2d0] sm:$0xff] }
  0x25   :  { %202 = vmatpush.msra.mxu1 %v66_v42  ;;  %240 = vmatpush.msra.mxu3 %v100_v52  ;;  %v156_v11 = vld.sshfl [vmem:[#allocation1 + $0x10] sm:$0xff pattern:$0x73625140]  ;;  %v144_v15 = vld [vmem:[#allocation5 + $0x308] sm:$0xff]  ;;  %v117_v27 = vld [vmem:[#allocation5 + $0x230] sm:$0xff] }
  0x26   :  { %183 = vmatpush.msra.mxu0 %v49_v45  ;;  %221 = vmatpush.msra.mxu2 %v83_v51  ;;  %v95_v12 = vld [vmem:[#allocation5 + $0x180] sm:$0xff]  ;;  %v154_v16 = vld.sshfl [vmem:[#allocation1] sm:$0xff pattern:$0x73625140]  ;;  %v118_v24 = vld [vmem:[#allocation5 + $0x238] sm:$0xff] }
  0x27   :  { %203 = vmatpush.msra.mxu1 %v65_v46  ;;  %241 = vmatpush.msra.mxu3 %v99_v59  ;;  %v120_v17 = vld [vmem:[#allocation5 + $0x248] sm:$0xff]  ;;  %v155_v20 = vld.sshfl [vmem:[#allocation1 + $0x8] sm:$0xff pattern:$0x73625140]  ;;  %v119_v21 = vld [vmem:[#allocation5 + $0x240] sm:$0xff] }
  0x28   :  { %184 = vmatpush.msra.mxu0 %v48_v49  ;;  %222 = vmatpush.msra.mxu2 %v82_v58  ;;  %v136_v18 = vld [vmem:[#allocation5 + $0x2c8] sm:$0xff]  ;;  %v135_v22 = vld [vmem:[#allocation5 + $0x2c0] sm:$0xff]  ;;  %v134_v25 = vld [vmem:[#allocation5 + $0x2b8] sm:$0xff] }
  0x29   :  { %204 = vmatpush.msra.mxu1 %v64_v50  ;;  %242 = vmatpush.msra.mxu3 %v98_v63  ;;  %v157_v19 = vld.sshfl [vmem:[#allocation1 + $0x18] sm:$0xff pattern:$0x73625140]  ;;  %v133_v28 = vld [vmem:[#allocation5 + $0x2b0] sm:$0xff]  ;;  %v114_v33 = vld [vmem:[#allocation5 + $0x218] sm:$0xff] }
  0x2a   :  { %185 = vmatpush.msra.mxu0 %v47_v53  ;;  %223 = vmatpush.msra.mxu2 %v81_v62  ;;  %v143_v23 = vld [vmem:[#allocation5 + $0x300] sm:$0xff]  ;;  %v116_v29 = vld [vmem:[#allocation5 + $0x228] sm:$0xff]  ;;  %v130_v34 = vld [vmem:[#allocation5 + $0x298] sm:$0xff] }
  0x2b   :  { %205 = vmatpush.msra.mxu1 %v63_v54  ;;  %243 = vmatpush.msra.mxu3 %v97_v4  ;;  %v160_v26 = vld.sshfl [vmem:[#allocation1 + $0x30] sm:$0xff pattern:$0x73625140]  ;;  %v132_v30 = vld [vmem:[#allocation5 + $0x2a8] sm:$0xff]  ;;  %v113_v35 = vld [vmem:[#allocation5 + $0x210] sm:$0xff] }
  0x2c   :  { %250 = vmatpush.msrb.mxu0 %v126_v56  ;;  %224 = vmatpush.msra.mxu2 %v80_v3  ;;  %v115_v31 = vld [vmem:[#allocation5 + $0x220] sm:$0xff]  ;;  %v129_v36 = vld [vmem:[#allocation5 + $0x290] sm:$0xff]  ;;  %v112_v37 = vld [vmem:[#allocation5 + $0x208] sm:$0xff] }
  0x2d   :  { %270 = vmatpush.msrb.mxu1 %v142_v57  ;;  %244 = vmatpush.msra.mxu3 %v96_v8  ;;  %v131_v32 = vld [vmem:[#allocation5 + $0x2a0] sm:$0xff]  ;;  %v128_v38 = vld [vmem:[#allocation5 + $0x288] sm:$0xff]  ;;  %v159_v42 = vld.sshfl [vmem:[#allocation1 + $0x28] sm:$0xff pattern:$0x73625140] }
  0x2e   :  { %251 = vmatpush.msrb.mxu0 %v125_v60  ;;  %225 = vmatpush.msra.mxu2 %v79_v7  ;;  %v111_v39 = vld [vmem:[#allocation5 + $0x200] sm:$0xff]  ;;  %v158_v41 = vld.sshfl [vmem:[#allocation1 + $0x20] sm:$0xff pattern:$0x73625140] }
  0x2f   :  { %271 = vmatpush.msrb.mxu1 %v141_v61  ;;  %226 = vmatmul.f32.vlgmr.msra.gmra.mxu2 %v156_v11  ;;  %v127_v40 = vld [vmem:[#allocation5 + $0x280] sm:$0xff]  ;;  %v335_v43 = vld [vmem:[%s453_s2] ss:$0 sm:$0xff] }
  0x30   :  { %252 = vmatpush.msrb.mxu0 %v124_v1  ;;  %245 = vmatpush.msra.mxu3 %v95_v12 }
  0x31   :  { %272 = vmatpush.msrb.mxu1 %v140_v2  ;;  %304 = vmatpush.msrb.mxu2 %v144_v15 }
  0x32   :  { %253 = vmatpush.msrb.mxu0 %v123_v5  ;;  %246 = vmatmul.f32.vlgmr.msra.gmra.mxu3 %v157_v19 }
  0x33   :  { %273 = vmatpush.msrb.mxu1 %v139_v6  ;;  %186 = vmatmul.f32.vlgmr.msra.gmra.mxu0 %v154_v16 }
  0x34   :  { %254 = vmatpush.msrb.mxu0 %v122_v9  ;;  %206 = vmatmul.f32.vlgmr.msra.gmra.mxu1 %v155_v20 }
  0x35   :  { %274 = vmatpush.msrb.mxu1 %v138_v10  ;;  %305 = vmatpush.msrb.mxu2 %v143_v23 }
  0x36   :  { %255 = vmatpush.msrb.mxu0 %v121_v13 }
  0x37   :  { %275 = vmatpush.msrb.mxu1 %v137_v14  ;;  %329 = vmatmul.msk.f32.vlgmr.msrb.gmra.mxu2 %vm167_vm0, %v160_v26 }
  0x38   :  { %256 = vmatpush.msrb.mxu0 %v120_v17 }
  0x39   :  { %276 = vmatpush.msrb.mxu1 %v136_v18 }
  0x3a   :  { %257 = vmatpush.msrb.mxu0 %v119_v21 }
  0x3b   :  { %277 = vmatpush.msrb.mxu1 %v135_v22 }
  0x3c   :  { %258 = vmatpush.msrb.mxu0 %v118_v24 }
  0x3d   :  { %278 = vmatpush.msrb.mxu1 %v134_v25 }
  0x3e   :  { %259 = vmatpush.msrb.mxu0 %v117_v27 }
  0x3f   :  { %279 = vmatpush.msrb.mxu1 %v133_v28 }
  0x40   :  { %260 = vmatpush.msrb.mxu0 %v116_v29 }
  0x41   :  { %280 = vmatpush.msrb.mxu1 %v132_v30 }
  0x42   :  { %261 = vmatpush.msrb.mxu0 %v115_v31 }
  0x43   :  { %281 = vmatpush.msrb.mxu1 %v131_v32 }
  0x44   :  { %262 = vmatpush.msrb.mxu0 %v114_v33 }
  0x45   :  { %282 = vmatpush.msrb.mxu1 %v130_v34 }
  0x46   :  { %263 = vmatpush.msrb.mxu0 %v113_v35 }
  0x47   :  { %283 = vmatpush.msrb.mxu1 %v129_v36 }
  0x48   :  { %264 = vmatpush.msrb.mxu0 %v112_v37 }
  0x49   :  { %284 = vmatpush.msrb.mxu1 %v128_v38 }
  0x4a   :  { %265 = vmatpush.msrb.mxu0 %v111_v39 }
  0x4b   :  { %285 = vmatpush.msrb.mxu1 %v127_v40  ;;  %266 = vmatmul.f32.vlgmr.msrb.gmra.mxu0 %v158_v41 }
  0x4c   :  { %286 = vmatmul.f32.vlgmr.msrb.gmra.mxu1 %v159_v42 }
  0xb0   :  { %v187_v44 = vpop.f32.mrf.mxu0 }
  0xb1   :  { %v188_v45 = vadd.f32 %v335_v43, %v187_v44  ;;  %v207_v46 = vpop.f32.mrf.mxu1 }
  0xb2   :  { %v227_v48 = vpop.f32.mrf.mxu2 }
  0xb3   :  { %v208_v47 = vadd.f32 %v207_v46, %v188_v45 }
  0xb5   :  { %v228_v49 = vadd.f32 %v227_v48, %v208_v47  ;;  %v247_v50 = vpop.f32.mrf.mxu3 }
  0xb7   :  { %v248_v51 = vadd.f32 %v247_v50, %v228_v49 }
  0xba   :  { %v307_v55 = vpop.f32.mrf.mxu2 }
  0xc8   :  { %v267_v52 = vpop.f32.mrf.mxu0 }
  0xc9   :  { %v287_v53 = vpop.f32.mrf.mxu1  ;;  %v268_v54 = vadd.f32 %v267_v52, %v248_v51 }
  0xcb   :  { %v288_v56 = vadd.f32 %v287_v53, %v268_v54 }
  0xcd   :  { %v308_v57 = vadd.f32 %v307_v55, %v288_v56 }
  0xcf   :  { %310 = vst [vmem:[#allocation7] sm:$0x3] %v308_v57 }
  0xd0   :  { %321 = dma.vmem_to_hbm [thread:$0]  %s317_s25, 32, %s319_s28, [#allocation4]  }
  0xd1   :  { %412 = dma.done.wait [#allocation4], 32  }
  0xd2   :  { %413 = vsyncadd [#allocation4], 4294967264 }
  0xd3   :  { %326 = vsyncpa [#allocation3], 1 }
  0xd4   :  { %327 = vsyncpa [#allocation6], 1 }
  0xd5   :  { %328 = vsyncpa [#allocation4], 1 }

</bundles_post_ra>
